<compile_context>
chip_gen: v5e
topology: v5e:2x2
jax: 0.10.0
libtpu: 0.0.40
codegen_flags: <defaults>
</compile_context>

<pallas_src>
import math

import jax
import jax.numpy as jnp
from jax.experimental import pallas as pl
from jax.experimental.pallas import tpu as pltpu

# Walker2d-v5 environment constants (hard-coded; no gym dependency).
STATE_DIM = 17
ACTION_DIM = 6
ACTION_BOUND = 1.0

HID1 = 400
HID2 = 300


def _cdiv(a, b):
    return (a + b - 1) // b


def _round_up(a, m):
    return _cdiv(a, m) * m


def _chip_caps():
    """(tile_b cap, vmem_limit_bytes, split_for_megacore) per TPU generation."""
    try:
        kind = jax.devices()[0].device_kind.lower()
    except Exception:
        kind = ""
    if "v7" in kind or "7x" in kind:
        # v7x: 64 MiB VMEM/TC and 2 TCs/chip -> smaller tiles, >=2 grid tiles.
        return 2048, 32 * 1024 * 1024, True
    # v5e / v6e: 128 MiB VMEM, single TC -> bigger tiles, fewer grid steps.
    return 4096, 64 * 1024 * 1024, False


def _policy_kernel(action_bound):
    """Returns the kernel body with the scalar action_bound closed over."""

    def kernel(x_ref, w1_ref, b1_ref, w2_ref, b2_ref, w3_ref, b3_ref, o_ref):
        # fc1: cast the f32 state block to bf16 in-kernel (no wrapper convert),
        # bf16 x bf16 MXU matmul with f32 accumulate; bias + ReLU in f32.
        h1 = jnp.dot(x_ref[...].astype(jnp.bfloat16), w1_ref[...],
                     preferred_element_type=jnp.float32)
        h1 = jnp.maximum(h1 + b1_ref[...], 0.0)
        # fc2: cast activation to bf16 only for the matmul input.
        h2 = jnp.dot(h1.astype(jnp.bfloat16), w2_ref[...],
                     preferred_element_type=jnp.float32)
        h2 = jnp.maximum(h2 + b2_ref[...], 0.0)
        # fc3 + tanh (EUP); skip the scale when action_bound == 1.0.
        o = jnp.dot(h2.astype(jnp.bfloat16), w3_ref[...],
                    preferred_element_type=jnp.float32)
        o = jnp.tanh(o + b3_ref[...])
        if action_bound != 1.0:
            o = o * action_bound
        o_ref[...] = o.astype(o_ref.dtype)

    return kernel


def policy_net_forward(x, params, action_bound=ACTION_BOUND):
    """Pallas forward pass. x: [B, state_dim] float32 (bf16 cast is in-kernel)."""
    w1, b1, w2, b2, w3, b3 = params
    B, state_dim = x.shape
    action_dim = w3.shape[1]

    cap, vmem_limit, split_for_megacore = _chip_caps()

    if B < 8:
        # Full-array block (allowed when block dims == array dims): no pad/slice.
        tile_b, n_tiles, bp = B, 1, B
    else:
        if split_for_megacore and B >= 16:
            # v7x: at least 2 tiles so both TensorCores get work.
            tile_b = min(cap, _round_up(_cdiv(B, 2), 8))
        else:
            tile_b = min(cap, _round_up(B, 8))
        n_tiles = _cdiv(B, tile_b)
        bp = n_tiles * tile_b

    if bp != B:
        x = jnp.pad(x, ((0, bp - B), (0, 0)))

    def resident(arr):
        # Full-array block, constant index map -> fetched once, stays in VMEM.
        # (Default double-buffering of these residents costs ~0.5 MB; fine.)
        return pl.BlockSpec(arr.shape, lambda i: (0,) * arr.ndim)

    flops = 2 * bp * (state_dim * HID1 + HID1 * HID2 + HID2 * action_dim)
    bytes_accessed = (
        bp * state_dim * 4
        + sum(p.size * p.dtype.itemsize for p in params)
        + bp * action_dim * 4
    )

    out = pl.pallas_call(
        _policy_kernel(float(action_bound)),
        out_shape=jax.ShapeDtypeStruct((bp, action_dim), jnp.float32),
        grid=(n_tiles,),
        in_specs=[
            pl.BlockSpec((tile_b, state_dim), lambda i: (i, 0)),
            resident(w1), resident(b1),
            resident(w2), resident(b2),
            resident(w3), resident(b3),
        ],
        out_specs=pl.BlockSpec((tile_b, action_dim), lambda i: (i, 0)),
        compiler_params=pltpu.CompilerParams(
            dimension_semantics=("parallel",),
            vmem_limit_bytes=vmem_limit,
        ),
        cost_estimate=pl.CostEstimate(
            flops=flops,
            transcendentals=bp * action_dim,
            bytes_accessed=bytes_accessed,
        ),
    )(x, w1, b1, w2, b2, w3, b3)

    return out[:B] if bp != B else out


def init_params(key, state_dim=STATE_DIM, action_dim=ACTION_DIM):
    """Deterministic synthetic init matching PolicyNet.__init__ semantics:
    fc1/fc2 uniform in [-1/sqrt(fan_in), 1/sqrt(fan_in)], fc3 in [-0.003, 0.003].
    Weights stored [in, out] in bf16 (MXU inputs); biases [1, out] in f32."""
    k = jax.random.split(key, 6)
    w1_lim = 1.0 / math.sqrt(state_dim)
    w2_lim = 1.0 / math.sqrt(HID1)
    w3_lim = 0.003

    w1 = jax.random.uniform(k[0], (state_dim, HID1), jnp.float32,
                            -w1_lim, w1_lim).astype(jnp.bfloat16)
    b1 = jax.random.uniform(k[1], (1, HID1), jnp.float32, -w1_lim, w1_lim)
    w2 = jax.random.uniform(k[2], (HID1, HID2), jnp.float32,
                            -w2_lim, w2_lim).astype(jnp.bfloat16)
    b2 = jax.random.uniform(k[3], (1, HID2), jnp.float32, -w2_lim, w2_lim)
    w3 = jax.random.uniform(k[4], (HID2, action_dim), jnp.float32,
                            -w3_lim, w3_lim).astype(jnp.bfloat16)
    b3 = jax.random.uniform(k[5], (1, action_dim), jnp.float32, -w3_lim, w3_lim)
    return (w1, b1, w2, b2, w3, b3)


def reference_forward(x, params, action_bound=ACTION_BOUND):
    """Pure-JAX reference with the same bf16-input / f32-accumulate recipe.
    Note: bf16 inputs drop mantissa bits vs. an f32 PyTorch PolicyNet; the
    kernel matches this reference tightly, and an f32 baseline to ~2e-3."""
    w1, b1, w2, b2, w3, b3 = params
    xb = x.astype(jnp.bfloat16)
    h1 = jnp.dot(xb, w1, preferred_element_type=jnp.float32) + b1
    h1 = jnp.maximum(h1, 0.0)
    h2 = jnp.dot(h1.astype(jnp.bfloat16), w2,
                 preferred_element_type=jnp.float32) + b2
    h2 = jnp.maximum(h2, 0.0)
    o = jnp.tanh(jnp.dot(h2.astype(jnp.bfloat16), w3,
                         preferred_element_type=jnp.float32) + b3)
    return o * action_bound if action_bound != 1.0 else o


if __name__ == "__main__":
    key = jax.random.PRNGKey(0)
    pkey, xkey, xkey2 = jax.random.split(key, 3)

    params = init_params(pkey)

    # Small inference-style batch (B < 8 path: full-dim block, no pad/slice).
    batch = 2
    x = jax.random.normal(xkey, (batch, STATE_DIM), dtype=jnp.float32)
    out = jax.block_until_ready(policy_net_forward(x, params))
    ref = reference_forward(x, params)
    assert out.shape == (batch, ACTION_DIM), out.shape
    assert jnp.allclose(out, ref, atol=2e-3, rtol=2e-3), (
        f"max abs diff = {jnp.max(jnp.abs(out - ref))}"
    )

    # Replay-style batch (tiled/padded path; exercises grid + pad/slice).
    batch2 = 50
    x2 = jax.random.normal(xkey2, (batch2, STATE_DIM), dtype=jnp.float32)
    out2 = jax.block_until_ready(policy_net_forward(x2, params))
    ref2 = reference_forward(x2, params)
    assert out2.shape == (batch2, ACTION_DIM), out2.shape
    assert jnp.allclose(out2, ref2, atol=2e-3, rtol=2e-3), (
        f"max abs diff = {jnp.max(jnp.abs(out2 - ref2))}"
    )

    print("KERNEL_OK")
</pallas_src>

<mosaic_0001>
module attributes {stable_mosaic.version = 11 : i64} {
  func.func @kernel(%arg0: i32, %arg1: memref<2x17xf32, #tpu.memory_space<vmem>>, %arg2: memref<17x400xbf16, #tpu.memory_space<vmem>>, %arg3: memref<1x400xf32, #tpu.memory_space<vmem>>, %arg4: memref<400x300xbf16, #tpu.memory_space<vmem>>, %arg5: memref<1x300xf32, #tpu.memory_space<vmem>>, %arg6: memref<300x6xbf16, #tpu.memory_space<vmem>>, %arg7: memref<1x6xf32, #tpu.memory_space<vmem>>, %arg8: memref<2x6xf32, #tpu.memory_space<vmem>>) attributes {dimension_semantics = [#tpu.dimension_semantics<parallel>], iteration_bounds = array<i64: 1>, scalar_prefetch = 0 : i64, scratch_operands = 0 : i64, tpu.core_type = #tpu.core_type<tc>, window_params = [{transform_indices = @transform_0, window_bounds = array<i64: 2, 17>}, {pipeline_mode = #tpu.pipeline_mode<synchronous>, transform_indices = @transform_1, window_bounds = array<i64: 17, 400>}, {pipeline_mode = #tpu.pipeline_mode<synchronous>, transform_indices = @transform_2, window_bounds = array<i64: 1, 400>}, {pipeline_mode = #tpu.pipeline_mode<synchronous>, transform_indices = @transform_3, window_bounds = array<i64: 400, 300>}, {pipeline_mode = #tpu.pipeline_mode<synchronous>, transform_indices = @transform_4, window_bounds = array<i64: 1, 300>}, {pipeline_mode = #tpu.pipeline_mode<synchronous>, transform_indices = @transform_5, window_bounds = array<i64: 300, 6>}, {pipeline_mode = #tpu.pipeline_mode<synchronous>, transform_indices = @transform_6, window_bounds = array<i64: 1, 6>}, {transform_indices = @transform_7, window_bounds = array<i64: 2, 6>}]} {
    %c0 = arith.constant 0 : index
    %c0_0 = arith.constant 0 : index
    %0 = vector.load %arg1[%c0, %c0_0] : memref<2x17xf32, #tpu.memory_space<vmem>>, vector<2x17xf32>
    %1 = arith.truncf %0 : vector<2x17xf32> to vector<2x17xbf16>
    %c0_1 = arith.constant 0 : index
    %c0_2 = arith.constant 0 : index
    %2 = vector.load %arg2[%c0_1, %c0_2] : memref<17x400xbf16, #tpu.memory_space<vmem>>, vector<17x400xbf16>
    %cst = arith.constant dense<0.000000e+00> : vector<2x400xf32>
    %3 = tpu.matmul %1, %2, %cst {dimension_numbers = #tpu.dot_dimension_numbers<[1], [0], [0], [1], [0, 0, 1, 1], [], []>} : vector<2x17xbf16>, vector<17x400xbf16>, vector<2x400xf32> -> vector<2x400xf32>
    %c0_3 = arith.constant 0 : index
    %c0_4 = arith.constant 0 : index
    %4 = vector.load %arg3[%c0_3, %c0_4] : memref<1x400xf32, #tpu.memory_space<vmem>>, vector<1x400xf32>
    %5 = vector.broadcast %4 : vector<1x400xf32> to vector<2x400xf32>
    %6 = arith.addf %3, %5 : vector<2x400xf32>
    %cst_5 = arith.constant 0.000000e+00 : f32
    %7 = vector.broadcast %cst_5 : f32 to vector<2x400xf32>
    %8 = arith.maximumf %6, %7 : vector<2x400xf32>
    %9 = arith.truncf %8 : vector<2x400xf32> to vector<2x400xbf16>
    %c0_6 = arith.constant 0 : index
    %c0_7 = arith.constant 0 : index
    %10 = vector.load %arg4[%c0_6, %c0_7] : memref<400x300xbf16, #tpu.memory_space<vmem>>, vector<400x300xbf16>
    %cst_8 = arith.constant dense<0.000000e+00> : vector<2x300xf32>
    %11 = tpu.matmul %9, %10, %cst_8 {dimension_numbers = #tpu.dot_dimension_numbers<[1], [0], [0], [1], [0, 0, 1, 1], [], []>} : vector<2x400xbf16>, vector<400x300xbf16>, vector<2x300xf32> -> vector<2x300xf32>
    %c0_9 = arith.constant 0 : index
    %c0_10 = arith.constant 0 : index
    %12 = vector.load %arg5[%c0_9, %c0_10] : memref<1x300xf32, #tpu.memory_space<vmem>>, vector<1x300xf32>
    %13 = vector.broadcast %12 : vector<1x300xf32> to vector<2x300xf32>
    %14 = arith.addf %11, %13 : vector<2x300xf32>
    %cst_11 = arith.constant 0.000000e+00 : f32
    %15 = vector.broadcast %cst_11 : f32 to vector<2x300xf32>
    %16 = arith.maximumf %14, %15 : vector<2x300xf32>
    %17 = arith.truncf %16 : vector<2x300xf32> to vector<2x300xbf16>
    %c0_12 = arith.constant 0 : index
    %c0_13 = arith.constant 0 : index
    %18 = vector.load %arg6[%c0_12, %c0_13] : memref<300x6xbf16, #tpu.memory_space<vmem>>, vector<300x6xbf16>
    %cst_14 = arith.constant dense<0.000000e+00> : vector<2x6xf32>
    %19 = tpu.matmul %17, %18, %cst_14 {dimension_numbers = #tpu.dot_dimension_numbers<[1], [0], [0], [1], [0, 0, 1, 1], [], []>} : vector<2x300xbf16>, vector<300x6xbf16>, vector<2x6xf32> -> vector<2x6xf32>
    %c0_15 = arith.constant 0 : index
    %c0_16 = arith.constant 0 : index
    %20 = vector.load %arg7[%c0_15, %c0_16] : memref<1x6xf32, #tpu.memory_space<vmem>>, vector<1x6xf32>
    %21 = vector.broadcast %20 : vector<1x6xf32> to vector<2x6xf32>
    %22 = arith.addf %19, %21 : vector<2x6xf32>
    %23 = math.tanh %22 : vector<2x6xf32>
    %c0_17 = arith.constant 0 : index
    %c0_18 = arith.constant 0 : index
    %24 = vector.load %arg8[%c0_17, %c0_18] : memref<2x6xf32, #tpu.memory_space<vmem>>, vector<2x6xf32>
    tpu.vector_store %arg8[%c0_17, %c0_18], %23 {strides = array<i32>} : memref<2x6xf32, #tpu.memory_space<vmem>>, vector<2x6xf32>,
    return
  }
  func.func @transform_0(%arg0: i32) -> (i32, i32) {
    %c0_i32 = arith.constant 0 : i32
    %c0_i32_0 = arith.constant 0 : i32
    return %arg0, %c0_i32 : i32, i32
  }
  func.func @transform_1(%arg0: i32) -> (i32, i32) {
    %c0_i32 = arith.constant 0 : i32
    %c0_i32_0 = arith.constant 0 : i32
    %c0_i32_1 = arith.constant 0 : i32
    return %c0_i32, %c0_i32_0 : i32, i32
  }
  func.func @transform_2(%arg0: i32) -> (i32, i32) {
    %c0_i32 = arith.constant 0 : i32
    %c0_i32_0 = arith.constant 0 : i32
    %c0_i32_1 = arith.constant 0 : i32
    return %c0_i32, %c0_i32_0 : i32, i32
  }
  func.func @transform_3(%arg0: i32) -> (i32, i32) {
    %c0_i32 = arith.constant 0 : i32
    %c0_i32_0 = arith.constant 0 : i32
    %c0_i32_1 = arith.constant 0 : i32
    return %c0_i32, %c0_i32_0 : i32, i32
  }
  func.func @transform_4(%arg0: i32) -> (i32, i32) {
    %c0_i32 = arith.constant 0 : i32
    %c0_i32_0 = arith.constant 0 : i32
    %c0_i32_1 = arith.constant 0 : i32
    return %c0_i32, %c0_i32_0 : i32, i32
  }
  func.func @transform_5(%arg0: i32) -> (i32, i32) {
    %c0_i32 = arith.constant 0 : i32
    %c0_i32_0 = arith.constant 0 : i32
    %c0_i32_1 = arith.constant 0 : i32
    return %c0_i32, %c0_i32_0 : i32, i32
  }
  func.func @transform_6(%arg0: i32) -> (i32, i32) {
    %c0_i32 = arith.constant 0 : i32
    %c0_i32_0 = arith.constant 0 : i32
    %c0_i32_1 = arith.constant 0 : i32
    return %c0_i32, %c0_i32_0 : i32, i32
  }
  func.func @transform_7(%arg0: i32) -> (i32, i32) {
    %c0_i32 = arith.constant 0 : i32
    %c0_i32_0 = arith.constant 0 : i32
    return %arg0, %c0_i32 : i32, i32
  }
}

</mosaic_0001>

<bundles_post_ra>
// kernel: tpu_custom_call.1
= control target key start
LH: loop header
LB: loop body
LE: loop exit
PB: predicated region body
PF: predicated region fallthrough
CT: control target
= control target key end

     0   :  { %12 = vsyncpa [#allocation3], 0  ;;  %s1805_s0 = inlined_call_operand.vmem [shape: f32[2,17], index: 0, kind: input, shape index: {}]   ;;  %s1806_s1 = inlined_call_operand.vmem [shape: bf16[17,400], index: 1, kind: input, shape index: {}]   ;;  %s1807_s2 = inlined_call_operand.vmem [shape: f32[1,400], index: 2, kind: input, shape index: {}]   ;;  %s1808_s3 = inlined_call_operand.hbm [shape: bf16[400,300], index: 3, kind: input, shape index: {}]   ;;  %s1809_s4 = inlined_call_operand.vmem [shape: f32[1,300], index: 4, kind: input, shape index: {}]   ;;  %s1810_s5 = inlined_call_operand.vmem [shape: bf16[300,6], index: 5, kind: input, shape index: {}]   ;;  %s1811_s6 = inlined_call_operand.vmem [shape: f32[1,6], index: 6, kind: input, shape index: {}]   ;;  %s1812_s7 = inlined_call_operand.hbm [shape: f32[2,6], index: 7, kind: output, shape index: {}]  }
   0x1   :  { %13 = vsyncpa [#allocation4], 0  ;;  %s24_s26 = sshll.u32 %s1808_s3, 4  ;;  %s1625_s27 = smov [#allocation2]   ;;  %s25_s26 = int_to_ptr.hbm [resolvable:$true] %s24_s26 }
   0x2   :  { %s26_s28 = sshll.u32 %s1625_s27, 4  ;;  %s1626_s29 = smov 192   ;;  %s27_s28 = int_to_ptr.vmem [resolvable:$true] %s26_s28 }
   0x3   :  { %s1627_s30 = smov 12  }
   0x4   :  { %32 = dma.hbm_to_vmem [thread:$0]  %s25_s26, 9600, %s27_s28, [#allocation3], %s1626_s29, %s1626_s29, %s1627_s30  }
   0x5   :  { %1621 = dma.done.wait [#allocation3], 9600  }
   0x6   :  { %1622 = vsyncadd [#allocation3], 4294957696  ;;  %vm96_vm0 = vcmask 1040384   ;;  %v50_v0 = vld [vmem:[%s1806_s1 + $0x20] sm:$0x11]  ;;  %v1628_v6 = vmov 0  }
   0x7   :  { %v51_v1 = vld [vmem:[%s1806_s1 + $0x28] sm:$0x11]  ;;  %v76_v2 = vunpack.c.l.b16 %v50_v0  ;;  %v77_v3 = vunpack.c.h.b16 %v50_v0  ;;  %v98_v7 = vsel %vm96_vm0, 65535, %v1628_v6  ;;  %v1069_v12 = vld [vmem:[%s1806_s1] sm:$0xf]  ;;  %vm92_vm1 = vcmask 138240  }
   0x8   :  { %v78_v4 = vunpack.c.l.b16 %v51_v1  ;;  %v79_v5 = vunpack.c.h.b16 %v51_v1  ;;  %v1469_v13 = vld [vmem:[%s1806_s1 + $0xc] sm:$0xf0]  ;;  %v1467_v14 = vld [vmem:[%s1806_s1 + $0x4] sm:$0xf]  ;;  %v1071_v15 = vld [vmem:[%s1806_s1 + $0x10] sm:$0xf0] }
   0x9   :  { %v84_v8 = vpack.c.b16 %v76_v2, %v76_v2  ;;  %v85_v9 = vpack.c.b16 %v77_v3, %v77_v3  ;;  %v1077_v16 = vld [vmem:[%s1806_s1 + $0x8] sm:$0xf]  ;;  %v1470_v17 = vld [vmem:[%s1806_s1 + $0x14] sm:$0xf0]  ;;  %v1468_v22 = vld [vmem:[%s1806_s1 + $0xc] sm:$0xf]  ;;  %v1070_v28 = vor.u32 %v1469_v13, %v1069_v12  ;;  %v1074_v29 = vor.u32 %v1467_v14, %v1071_v15 }
   0xa   :  { %v86_v10 = vpack.c.b16 %v78_v4, %v78_v4  ;;  %v87_v11 = vpack.c.b16 %v79_v5, %v79_v5  ;;  %v1079_v23 = vld [vmem:[%s1806_s1 + $0x18] sm:$0xf0]  ;;  %v1173_v24 = vld [vmem:[#allocation2 + $0xa8] sm:$0xf]  ;;  %v1493_v25 = vld [vmem:[#allocation2 + $0xb0] sm:$0xf0]  ;;  %v1078_v31 = vor.u32 %v1470_v17, %v1077_v16 }
   0xb   :  { %v100_v18 = vand.u32 %v98_v7, %v84_v8  ;;  %v103_v19 = vand.u32 %v98_v7, %v85_v9  ;;  %v1269_v26 = vld [vmem:[#allocation2 + $0x168] sm:$0xf]  ;;  %v1517_v27 = vld [vmem:[#allocation2 + $0x170] sm:$0xf0]  ;;  %v44_v30 = vld [vmem:[%s1805_s0] sm:$0x3]  ;;  %v1082_v32 = vor.u32 %v1468_v22, %v1079_v23  ;;  %v1174_v33 = vor.u32 %v1493_v25, %v1173_v24 }
   0xc   :  { %v106_v20 = vand.u32 %v98_v7, %v86_v10  ;;  %v109_v21 = vand.u32 %v98_v7, %v87_v11  ;;  %v1161_v34 = vld [vmem:[#allocation2 + $0x90] sm:$0xf]  ;;  %v1270_v35 = vor.u32 %v1517_v27, %v1269_v26  ;;  %v45_v36 = vpack.c.bf16 %v44_v30, %v44_v30  ;;  %v1490_v37 = vld [vmem:[#allocation2 + $0x98] sm:$0xf0]  ;;  %v1149_v40 = vld [vmem:[#allocation2 + $0x78] sm:$0xf] }
   0xd   :  { %117 = vmatpush.bf16.msra.mxu0 %v100_v18  ;;  %130 = vmatpush.bf16.msra.mxu1 %v103_v19  ;;  %v1257_v38 = vld [vmem:[#allocation2 + $0x150] sm:$0xf]  ;;  %v1514_v39 = vld [vmem:[#allocation2 + $0x158] sm:$0xf0]  ;;  %v1162_v41 = vor.u32 %v1490_v37, %v1161_v34  ;;  %v1487_v42 = vld [vmem:[#allocation2 + $0x80] sm:$0xf0] }
   0xe   :  { %143 = vmatpush.bf16.msra.mxu2 %v106_v20  ;;  %156 = vmatpush.bf16.msra.mxu3 %v109_v21  ;;  %v1258_v43 = vor.u32 %v1514_v39, %v1257_v38  ;;  %v1365_v44 = vld [vmem:[#allocation2 + $0x228] sm:$0xf]  ;;  %v1541_v45 = vld [vmem:[#allocation2 + $0x230] sm:$0xf0]  ;;  %v1245_v46 = vld [vmem:[#allocation2 + $0x138] sm:$0xf]  ;;  %v1150_v52 = vor.u32 %v1487_v42, %v1149_v40 }
   0xf   :  { %v1511_v47 = vld [vmem:[#allocation2 + $0x140] sm:$0xf0]  ;;  %v1366_v48 = vor.u32 %v1541_v45, %v1365_v44  ;;  %v1377_v49 = vld [vmem:[#allocation2 + $0x240] sm:$0xf]  ;;  %v1544_v50 = vld [vmem:[#allocation2 + $0x248] sm:$0xf0] }
  0x10   :  { %v1492_v51 = vld [vmem:[#allocation2 + $0xac] sm:$0xf]  ;;  %v1378_v53 = vor.u32 %v1544_v50, %v1377_v49  ;;  %v1175_v54 = vld [vmem:[#allocation2 + $0xb4] sm:$0xf0]  ;;  %v1353_v55 = vld [vmem:[#allocation2 + $0x210] sm:$0xf]  ;;  %v1246_v59 = vor.u32 %v1511_v47, %v1245_v46 }
  0x11   :  { %118 = vmatpush.bf16.msra.mxu0 %v1070_v28  ;;  %131 = vmatpush.bf16.msra.mxu1 %v1074_v29  ;;  %v1538_v56 = vld [vmem:[#allocation2 + $0x218] sm:$0xf0]  ;;  %v1137_v57 = vld [vmem:[#allocation2 + $0x60] sm:$0xf]  ;;  %v1484_v58 = vld [vmem:[#allocation2 + $0x68] sm:$0xf0]  ;;  %v1178_v61 = vor.u32 %v1492_v51, %v1175_v54 }
  0x12   :  { %144 = vmatpush.bf16.msra.mxu2 %v1078_v31  ;;  %157 = vmatpush.bf16.msra.mxu3 %v1082_v32  ;;  %v1233_v60 = vld [vmem:[#allocation2 + $0x120] sm:$0xf]  ;;  %v1354_v62 = vor.u32 %v1538_v56, %v1353_v55  ;;  %v1508_v63 = vld [vmem:[#allocation2 + $0x128] sm:$0xf0]  ;;  %v1489_v0 = vld [vmem:[#allocation2 + $0x94] sm:$0xf]  ;;  %v1138_v6 = vor.u32 %v1484_v58, %v1137_v57 }
  0x13   :  { %v1163_v1 = vld [vmem:[#allocation2 + $0x9c] sm:$0xf0]  ;;  %v1341_v3 = vld [vmem:[#allocation2 + $0x1f8] sm:$0xf]  ;;  %v1535_v4 = vld [vmem:[#allocation2 + $0x200] sm:$0xf0]  ;;  %v1234_v9 = vor.u32 %v1508_v63, %v1233_v60 }
  0x14   :  { %1083 = vmatmul.msk.bf16.vlgmr.msra.gmra.mxu0 %vm92_vm1, %v45_v36  ;;  %1084 = vmatmul.msk.bf16.vlgmr.msra.gmra.mxu1 %vm92_vm1, %v45_v36  ;;  %v1166_v2 = vor.u32 %v1489_v0, %v1163_v1  ;;  %v1342_v5 = vor.u32 %v1535_v4, %v1341_v3  ;;  %v1125_v7 = vld [vmem:[#allocation2 + $0x48] sm:$0xf]  ;;  %v1481_v8 = vld [vmem:[#allocation2 + $0x50] sm:$0xf0]  ;;  %v1486_v12 = vld [vmem:[#allocation2 + $0x7c] sm:$0xf] }
  0x15   :  { %683 = vmatpush.bf16.msrb.mxu0 %v1174_v33  ;;  %696 = vmatpush.bf16.msrb.mxu1 %v1270_v35  ;;  %v1221_v10 = vld [vmem:[#allocation2 + $0x108] sm:$0xf]  ;;  %v1505_v11 = vld [vmem:[#allocation2 + $0x110] sm:$0xf0]  ;;  %v1329_v14 = vld [vmem:[#allocation2 + $0x1e0] sm:$0xf]  ;;  %v1126_v18 = vor.u32 %v1481_v8, %v1125_v7 }
  0x16   :  { %1085 = vmatmul.msk.bf16.vlgmr.msra.gmra.mxu2 %vm92_vm1, %v45_v36  ;;  %1086 = vmatmul.msk.bf16.vlgmr.msra.gmra.mxu3 %vm92_vm1, %v45_v36  ;;  %v1151_v13 = vld [vmem:[#allocation2 + $0x84] sm:$0xf0]  ;;  %v1532_v15 = vld [vmem:[#allocation2 + $0x1e8] sm:$0xf0]  ;;  %v1113_v19 = vld [vmem:[#allocation2 + $0x30] sm:$0xf]  ;;  %v1222_v21 = vor.u32 %v1505_v11, %v1221_v10 }
  0x17   :  { %709 = vmatpush.bf16.msrb.mxu2 %v1366_v48  ;;  %729 = vmatpush.bf16.msrb.mxu3 %v1378_v53  ;;  %v1154_v16 = vor.u32 %v1486_v12, %v1151_v13  ;;  %v1330_v17 = vor.u32 %v1532_v15, %v1329_v14  ;;  %v1478_v20 = vld [vmem:[#allocation2 + $0x38] sm:$0xf0]  ;;  %v1209_v22 = vld [vmem:[#allocation2 + $0xf0] sm:$0xf]  ;;  %v1483_v24 = vld [vmem:[#allocation2 + $0x64] sm:$0xf] }
  0x18   :  { %v1502_v23 = vld [vmem:[#allocation2 + $0xf8] sm:$0xf0]  ;;  %v1139_v25 = vld [vmem:[#allocation2 + $0x6c] sm:$0xf0]  ;;  %v1317_v26 = vld [vmem:[#allocation2 + $0x1c8] sm:$0xf]  ;;  %v1114_v30 = vor.u32 %v1478_v20, %v1113_v19 }
  0x19   :  { %684 = vmatpush.bf16.msrb.mxu0 %v1162_v41  ;;  %697 = vmatpush.bf16.msrb.mxu1 %v1258_v43  ;;  %v1529_v27 = vld [vmem:[#allocation2 + $0x1d0] sm:$0xf0]  ;;  %v1142_v28 = vor.u32 %v1483_v24, %v1139_v25  ;;  %v1101_v31 = vld [vmem:[#allocation2 + $0x18] sm:$0xf]  ;;  %v1210_v32 = vor.u32 %v1502_v23, %v1209_v22  ;;  %v1475_v33 = vld [vmem:[#allocation2 + $0x20] sm:$0xf0] }
  0x1a   :  { %v1318_v29 = vor.u32 %v1529_v27, %v1317_v26  ;;  %v1197_v34 = vld [vmem:[#allocation2 + $0xd8] sm:$0xf]  ;;  %v1499_v35 = vld [vmem:[#allocation2 + $0xe0] sm:$0xf0]  ;;  %v1102_v36 = vor.u32 %v1475_v33, %v1101_v31  ;;  %v1089_v37 = vld [vmem:[#allocation2] sm:$0xf] }
  0x1b   :  { %735 = vmatpush.bf16.msra.mxu3 %v1178_v61  ;;  %710 = vmatpush.bf16.msrb.mxu2 %v1354_v62  ;;  %v1472_v38 = vld [vmem:[#allocation2 + $0x8] sm:$0xf0]  ;;  %v1198_v39 = vor.u32 %v1499_v35, %v1197_v34  ;;  %v1185_v41 = vld [vmem:[#allocation2 + $0xc0] sm:$0xf]  ;;  %v1271_v43 = vld [vmem:[#allocation2 + $0x174] sm:$0xf0] }
  0x1c   :  { %v1516_v40 = vld [vmem:[#allocation2 + $0x16c] sm:$0xf]  ;;  %v1367_v45 = vld [vmem:[#allocation2 + $0x234] sm:$0xf0]  ;;  %v1090_v46 = vor.u32 %v1472_v38, %v1089_v37  ;;  %v1513_v49 = vld [vmem:[#allocation2 + $0x154] sm:$0xf] }
  0x1d   :  { %685 = vmatpush.bf16.msrb.mxu0 %v1150_v52  ;;  %698 = vmatpush.bf16.msrb.mxu1 %v1246_v59  ;;  %v1496_v42 = vld [vmem:[#allocation2 + $0xc8] sm:$0xf0]  ;;  %v1274_v48 = vor.u32 %v1516_v40, %v1271_v43  ;;  %v1259_v51 = vld [vmem:[#allocation2 + $0x15c] sm:$0xf0]  ;;  %v1537_v52 = vld [vmem:[#allocation2 + $0x214] sm:$0xf] }
  0x1e   :  { %v1540_v44 = vld [vmem:[#allocation2 + $0x22c] sm:$0xf]  ;;  %v1186_v47 = vor.u32 %v1496_v42, %v1185_v41  ;;  %v1355_v53 = vld [vmem:[#allocation2 + $0x21c] sm:$0xf0]  ;;  %v1262_v54 = vor.u32 %v1513_v49, %v1259_v51  ;;  %v1510_v56 = vld [vmem:[#allocation2 + $0x13c] sm:$0xf] }
  0x1f   :  { %736 = vmatpush.bf16.msra.mxu3 %v1166_v2  ;;  %711 = vmatpush.bf16.msrb.mxu2 %v1342_v5  ;;  %v1370_v50 = vor.u32 %v1540_v44, %v1367_v45  ;;  %v1358_v55 = vor.u32 %v1537_v52, %v1355_v53  ;;  %v1247_v57 = vld [vmem:[#allocation2 + $0x144] sm:$0xf0]  ;;  %v1507_v59 = vld [vmem:[#allocation2 + $0x124] sm:$0xf]  ;;  %v1235_v60 = vld [vmem:[#allocation2 + $0x12c] sm:$0xf0] }
  0x20   :  { %v1250_v58 = vor.u32 %v1510_v56, %v1247_v57  ;;  %v1238_v61 = vor.u32 %v1507_v59, %v1235_v60  ;;  %v1504_v62 = vld [vmem:[#allocation2 + $0x10c] sm:$0xf]  ;;  %v1223_v63 = vld [vmem:[#allocation2 + $0x114] sm:$0xf0]  ;;  %v1501_v1 = vld [vmem:[#allocation2 + $0xf4] sm:$0xf] }
  0x21   :  { %686 = vmatpush.bf16.msrb.mxu0 %v1138_v6  ;;  %699 = vmatpush.bf16.msrb.mxu1 %v1234_v9  ;;  %v1226_v0 = vor.u32 %v1504_v62, %v1223_v63  ;;  %v1211_v2 = vld [vmem:[#allocation2 + $0xfc] sm:$0xf0]  ;;  %v1534_v4 = vld [vmem:[#allocation2 + $0x1fc] sm:$0xf]  ;;  %v1343_v5 = vld [vmem:[#allocation2 + $0x204] sm:$0xf0] }
  0x22   :  { %v1214_v3 = vor.u32 %v1501_v1, %v1211_v2  ;;  %v1346_v6 = vor.u32 %v1534_v4, %v1343_v5  ;;  %v1480_v7 = vld [vmem:[#allocation2 + $0x4c] sm:$0xf]  ;;  %v1127_v8 = vld [vmem:[#allocation2 + $0x54] sm:$0xf0]  ;;  %v1305_v10 = vld [vmem:[#allocation2 + $0x1b0] sm:$0xf] }
  0x23   :  { %737 = vmatpush.bf16.msra.mxu3 %v1154_v16  ;;  %712 = vmatpush.bf16.msrb.mxu2 %v1330_v17  ;;  %v1130_v9 = vor.u32 %v1480_v7, %v1127_v8  ;;  %v1526_v11 = vld [vmem:[#allocation2 + $0x1b8] sm:$0xf0]  ;;  %v1199_v14 = vld [vmem:[#allocation2 + $0xe4] sm:$0xf0]  ;;  %v1531_v16 = vld [vmem:[#allocation2 + $0x1e4] sm:$0xf] }
  0x24   :  { %v1306_v12 = vor.u32 %v1526_v11, %v1305_v10  ;;  %v1498_v13 = vld [vmem:[#allocation2 + $0xdc] sm:$0xf]  ;;  %v1331_v17 = vld [vmem:[#allocation2 + $0x1ec] sm:$0xf0]  ;;  %v1477_v19 = vld [vmem:[#allocation2 + $0x34] sm:$0xf] }
  0x25   :  { %687 = vmatpush.bf16.msrb.mxu0 %v1126_v18  ;;  %700 = vmatpush.bf16.msrb.mxu1 %v1222_v21  ;;  %v1202_v15 = vor.u32 %v1498_v13, %v1199_v14  ;;  %v1334_v18 = vor.u32 %v1531_v16, %v1331_v17  ;;  %v1115_v20 = vld [vmem:[#allocation2 + $0x3c] sm:$0xf0]  ;;  %v1293_v22 = vld [vmem:[#allocation2 + $0x198] sm:$0xf]  ;;  %v1523_v23 = vld [vmem:[#allocation2 + $0x1a0] sm:$0xf0] }
  0x26   :  { %v1118_v21 = vor.u32 %v1477_v19, %v1115_v20  ;;  %v1294_v24 = vor.u32 %v1523_v23, %v1293_v22  ;;  %v1495_v25 = vld [vmem:[#allocation2 + $0xc4] sm:$0xf]  ;;  %v1187_v26 = vld [vmem:[#allocation2 + $0xcc] sm:$0xf0]  ;;  %v1474_v31 = vld [vmem:[#allocation2 + $0x1c] sm:$0xf] }
  0x27   :  { %738 = vmatpush.bf16.msra.mxu3 %v1142_v28  ;;  %713 = vmatpush.bf16.msrb.mxu2 %v1318_v29  ;;  %v1190_v27 = vor.u32 %v1495_v25, %v1187_v26  ;;  %v1528_v28 = vld [vmem:[#allocation2 + $0x1cc] sm:$0xf]  ;;  %v1319_v29 = vld [vmem:[#allocation2 + $0x1d4] sm:$0xf0]  ;;  %v1281_v33 = vld [vmem:[#allocation2 + $0x180] sm:$0xf] }
  0x28   :  { %v1520_v34 = vld [vmem:[#allocation2 + $0x188] sm:$0xf0]  ;;  %v1525_v37 = vld [vmem:[#allocation2 + $0x1b4] sm:$0xf]  ;;  %v1307_v38 = vld [vmem:[#allocation2 + $0x1bc] sm:$0xf0] }
  0x29   :  { %688 = vmatpush.bf16.msrb.mxu0 %v1114_v30  ;;  %701 = vmatpush.bf16.msrb.mxu1 %v1210_v32  ;;  %v1322_v30 = vor.u32 %v1528_v28, %v1319_v29  ;;  %v1103_v32 = vld [vmem:[#allocation2 + $0x24] sm:$0xf0]  ;;  %v1471_v40 = vld [vmem:[#allocation2 + $0x4] sm:$0xf]  ;;  %v1091_v41 = vld [vmem:[#allocation2 + $0xc] sm:$0xf0] }
  0x2a   :  { %v1106_v35 = vor.u32 %v1474_v31, %v1103_v32  ;;  %v1094_v42 = vor.u32 %v1471_v40, %v1091_v41  ;;  %v1543_v43 = vld [vmem:[#allocation2 + $0x244] sm:$0xf]  ;;  %v1379_v44 = vld [vmem:[#allocation2 + $0x24c] sm:$0xf0]  ;;  %v52_v52 = vld [vmem:[%s1807_s2] sm:$0xf] }
  0x2b   :  { %739 = vmatpush.bf16.msra.mxu3 %v1130_v9  ;;  %714 = vmatpush.bf16.msrb.mxu2 %v1306_v12  ;;  %v1382_v45 = vor.u32 %v1543_v43, %v1379_v44  ;;  %v1519_v49 = vld [vmem:[#allocation2 + $0x184] sm:$0xf]  ;;  %v54_v53 = vperm.slane %v52_v52, 0  ;;  %v1373_v59 = vld [vmem:[#allocation2 + $0x230] sm:$0xf]  ;;  %v56_v1 = vperm.slane %v52_v52, 2 }
  0x2c   :  { %v1542_v60 = vld [vmem:[#allocation2 + $0x238] sm:$0xf0]  ;;  %v57_v2 = vperm.slane %v52_v52, 3  ;;  %v1361_v7 = vld [vmem:[#allocation2 + $0x218] sm:$0xf]  ;;  %vm679_vm2 = vcmask 130048  }
  0x2d   :  { %689 = vmatpush.bf16.msrb.mxu0 %v1102_v36  ;;  %702 = vmatpush.bf16.msrb.mxu1 %v1198_v39  ;;  %v1282_v36 = vor.u32 %v1520_v34, %v1281_v33  ;;  %v1310_v39 = vor.u32 %v1525_v37, %v1307_v38  ;;  %v1539_v8 = vld [vmem:[#allocation2 + $0x220] sm:$0xf0]  ;;  %v1181_v11 = vld [vmem:[#allocation2 + $0xb0] sm:$0xf]  ;;  %v1518_v17 = vld [vmem:[#allocation2 + $0x178] sm:$0xf0] }
  0x2e   :  { %v1362_v14 = vor.u32 %v1539_v8, %v1361_v7  ;;  %v1277_v16 = vld [vmem:[#allocation2 + $0x170] sm:$0xf]  ;;  %v1349_v20 = vld [vmem:[#allocation2 + $0x200] sm:$0xf]  ;;  %v1169_v26 = vld [vmem:[#allocation2 + $0x98] sm:$0xf] }
  0x2f   :  { %740 = vmatpush.bf16.msra.mxu3 %v1118_v21  ;;  %715 = vmatpush.bf16.msrb.mxu2 %v1294_v24  ;;  %v1536_v21 = vld [vmem:[#allocation2 + $0x208] sm:$0xf0]  ;;  %v1278_v25 = vor.u32 %v1518_v17, %v1277_v16  ;;  %v1265_v31 = vld [vmem:[#allocation2 + $0x158] sm:$0xf]  ;;  %v1515_v32 = vld [vmem:[#allocation2 + $0x160] sm:$0xf0] }
  0x30   :  { %v1350_v29 = vor.u32 %v1536_v21, %v1349_v20  ;;  %v1337_v33 = vld [vmem:[#allocation2 + $0x1e8] sm:$0xf]  ;;  %v1533_v34 = vld [vmem:[#allocation2 + $0x1f0] sm:$0xf0]  ;;  %v1266_v38 = vor.u32 %v1515_v32, %v1265_v31  ;;  %v1488_v41 = vld [vmem:[#allocation2 + $0x88] sm:$0xf0] }
  0x31   :  { %690 = vmatpush.bf16.msrb.mxu0 %v1090_v46  ;;  %703 = vmatpush.bf16.msrb.mxu1 %v1186_v47  ;;  %v1522_v46 = vld [vmem:[#allocation2 + $0x19c] sm:$0xf]  ;;  %v1295_v47 = vld [vmem:[#allocation2 + $0x1a4] sm:$0xf0]  ;;  %v1338_v40 = vor.u32 %v1533_v34, %v1337_v33  ;;  %v1512_v43 = vld [vmem:[#allocation2 + $0x148] sm:$0xf0] }
  0x32   :  { %v1325_v44 = vld [vmem:[#allocation2 + $0x1d0] sm:$0xf]  ;;  %v1479_v7 = vld [vmem:[#allocation2 + $0x40] sm:$0xf0]  ;;  %v1217_v8 = vld [vmem:[#allocation2 + $0xf8] sm:$0xf] }
  0x33   :  { %741 = vmatpush.bf16.msra.mxu3 %v1106_v35  ;;  %716 = vmatpush.bf16.msrb.mxu2 %v1282_v36  ;;  %v1109_v16 = vld [vmem:[#allocation2 + $0x20] sm:$0xf]  ;;  %v1476_v17 = vld [vmem:[#allocation2 + $0x28] sm:$0xf0]  ;;  %v1549_v32 = vld [vmem:[%s1810_s5 + $0x18] sm:$0xff]  ;;  %vm1004_vm3 = vcmask 1045504  }
  0x34   :  { %v1110_v21 = vor.u32 %v1476_v17, %v1109_v16  ;;  %v1550_v31 = vld [vmem:[%s1810_s5 + $0x20] sm:$0xff]  ;;  %v1559_v34 = vld [vmem:[%s1810_s5 + $0x68] sm:$0xff]  ;;  %vm1000_vm4 = vcmask 359424   ;;  %s1629_s19 = smov [#allocation5]   ;;  %s1057_s23 = sshll.u32 %s1812_s7, 4  ;;  %vm1048_vm5 = vcmask 41984   ;;  %s1058_s23 = int_to_ptr.hbm [resolvable:$true] %s1057_s23 }
  0x35   :  { %748 = vmatpush.bf16.msra.mxu0 %v1274_v48  ;;  %761 = vmatpush.bf16.msra.mxu1 %v1370_v50  ;;  %v1298_v48 = vor.u32 %v1522_v46, %v1295_v47  ;;  %v1283_v50 = vld [vmem:[#allocation2 + $0x18c] sm:$0xf0]  ;;  %v1546_v33 = vld [vmem:[%s1810_s5] sm:$0xff]  ;;  %s1055_s20 = sshll.u32 %s1629_s19, 4  ;;  %s1056_s20 = int_to_ptr.vmem [resolvable:$true] %s1055_s20 }
  0x36   :  { %v1286_v51 = vor.u32 %v1519_v49, %v1283_v50  ;;  %v1485_v49 = vld [vmem:[#allocation2 + $0x70] sm:$0xf0]  ;;  %v1241_v50 = vld [vmem:[#allocation2 + $0x128] sm:$0xf] }
  0x37   :  { %742 = vmatpush.bf16.msra.mxu3 %v1094_v42  ;;  %781 = vmatpush.bf16.msra.mxu2 %v1382_v45  ;;  %v1253_v42 = vld [vmem:[#allocation2 + $0x140] sm:$0xf]  ;;  %v1530_v45 = vld [vmem:[#allocation2 + $0x1d8] sm:$0xf0] }
  0x38   :  { %v1254_v47 = vor.u32 %v1512_v43, %v1253_v42  ;;  %v1554_v43 = vld [vmem:[%s1810_s5 + $0x40] sm:$0xff] }
  0x39   :  { %749 = vmatpush.bf16.msra.mxu0 %v1262_v54  ;;  %762 = vmatpush.bf16.msra.mxu1 %v1358_v55  ;;  %v55_v54 = vperm.slane %v52_v52, 1  ;;  %v1326_v52 = vor.u32 %v1530_v45, %v1325_v44 }
  0x3d   :  { %750 = vmatpush.bf16.msra.mxu0 %v1250_v58  ;;  %763 = vmatpush.bf16.msra.mxu1 %v1346_v6 }
  0x41   :  { %751 = vmatpush.bf16.msra.mxu0 %v1238_v61  ;;  %764 = vmatpush.bf16.msra.mxu1 %v1334_v18  ;;  %v1385_v61 = vld [vmem:[#allocation2 + $0x248] sm:$0xf] }
  0x45   :  { %752 = vmatpush.bf16.msra.mxu0 %v1226_v0  ;;  %765 = vmatpush.bf16.msra.mxu1 %v1322_v30  ;;  %v1545_v0 = vld [vmem:[#allocation2 + $0x250] sm:$0xf0]  ;;  %v1491_v30 = vld [vmem:[#allocation2 + $0xa0] sm:$0xf0] }
  0x46   :  { %v1386_v4 = vor.u32 %v1545_v0, %v1385_v61  ;;  %v1170_v37 = vor.u32 %v1491_v30, %v1169_v26  ;;  %v1506_v61 = vld [vmem:[#allocation2 + $0x118] sm:$0xf0]  ;;  %v1301_v0 = vld [vmem:[#allocation2 + $0x1a0] sm:$0xf]  ;;  %v1497_v26 = vld [vmem:[#allocation2 + $0xd0] sm:$0xf0] }
  0x49   :  { %753 = vmatpush.bf16.msra.mxu0 %v1214_v3  ;;  %766 = vmatpush.bf16.msra.mxu1 %v1310_v39  ;;  %v1374_v3 = vor.u32 %v1542_v60, %v1373_v59  ;;  %v1157_v39 = vld [vmem:[#allocation2 + $0x80] sm:$0xf]  ;;  %v1482_v59 = vld [vmem:[#allocation2 + $0x58] sm:$0xf0]  ;;  %v1229_v60 = vld [vmem:[#allocation2 + $0x110] sm:$0xf] }
  0x4a   :  { %v1158_v46 = vor.u32 %v1488_v41, %v1157_v39  ;;  %v1555_v41 = vld [vmem:[%s1810_s5 + $0x48] sm:$0xff] }
  0x4d   :  { %754 = vmatpush.bf16.msra.mxu0 %v1202_v15  ;;  %767 = vmatpush.bf16.msra.mxu1 %v1298_v48  ;;  %v1494_v15 = vld [vmem:[#allocation2 + $0xb8] sm:$0xf0]  ;;  %v1145_v48 = vld [vmem:[#allocation2 + $0x68] sm:$0xf] }
  0x4e   :  { %v1182_v24 = vor.u32 %v1494_v15, %v1181_v11  ;;  %v1551_v11 = vld [vmem:[%s1810_s5 + $0x28] sm:$0xff] }
  0x51   :  { %755 = vmatpush.bf16.msra.mxu0 %v1190_v27  ;;  %768 = vmatpush.bf16.msra.mxu1 %v1286_v51  ;;  %v1509_v51 = vld [vmem:[#allocation2 + $0x130] sm:$0xf0] }
  0x91   :  { %v120_v55 = vpop.f32.mrf.mxu0  ;;  %v133_v56 = vpop.f32.mrf.mxu1 }
  0x92   :  { %v121_v57 = vadd.f32 %v120_v55, %v54_v53  ;;  %v134_v58 = vadd.f32 %v133_v56, %v55_v54  ;;  %v1553_v53 = vld [vmem:[%s1810_s5 + $0x38] sm:$0xff]  ;;  %v1527_v55 = vld [vmem:[#allocation2 + $0x1c0] sm:$0xf0]  ;;  %v1146_v56 = vor.u32 %v1485_v49, %v1145_v48  ;;  %v1464_v48 = vld [vmem:[%s1810_s5 + $0x90] sm:$0xf] }
  0x93   :  { %v1313_v54 = vld [vmem:[#allocation2 + $0x1b8] sm:$0xf]  ;;  %v1564_v49 = vld [vmem:[%s1810_s5 + $0x90] sm:$0x30] }
  0x94   :  { %v163_v62 = vmax.f32 %v121_v57, 0.0  ;;  %v164_v63 = vmax.f32 %v134_v58, 0.0  ;;  %v1242_v57 = vor.u32 %v1509_v51, %v1241_v50  ;;  %v1133_v58 = vld [vmem:[#allocation2 + $0x50] sm:$0xf]  ;;  %v1465_v50 = vor.u32 %v1564_v49, %v1464_v48 }
  0x96   :  { %v1713_v5 = vpack.c.bf16 %v163_v62, %v163_v62  ;;  %v1715_v6 = vpack.c.bf16 %v164_v63, %v164_v63  ;;  %v1314_v62 = vor.u32 %v1527_v55, %v1313_v54  ;;  %v1552_v63 = vld [vmem:[%s1810_s5 + $0x30] sm:$0xff] }
  0x98   :  { %691 = vmatmul.bf16.vlgmr.msrb.gmra.mxu0 %v1713_v5  ;;  %704 = vmatmul.bf16.vlgmr.msrb.gmra.mxu1 %v1715_v6 }
  0x99   :  { %v146_v9 = vpop.f32.mrf.mxu2  ;;  %v159_v10 = vpop.f32.mrf.mxu3  ;;  %813 = vmatpush.bf16.msrb.mxu0 %v1374_v3  ;;  %833 = vmatpush.bf16.msrb.mxu1 %v1386_v4  ;;  %v1230_v3 = vor.u32 %v1506_v61, %v1229_v60  ;;  %v1121_v4 = vld [vmem:[#allocation2 + $0x38] sm:$0xf] }
  0x9a   :  { %v147_v12 = vadd.f32 %v146_v9, %v56_v1  ;;  %v160_v13 = vadd.f32 %v159_v10, %v57_v2  ;;  %v122_v18 = vpop.f32.mrf.mxu0  ;;  %v135_v19 = vpop.f32.mrf.mxu1  ;;  %v1524_v1 = vld [vmem:[#allocation2 + $0x1a8] sm:$0xf0]  ;;  %v1134_v2 = vor.u32 %v1482_v59, %v1133_v58  ;;  %v1503_v9 = vld [vmem:[#allocation2 + $0x100] sm:$0xf0] }
  0x9b   :  { %v1302_v10 = vor.u32 %v1524_v1, %v1301_v0  ;;  %v1218_v15 = vor.u32 %v1503_v9, %v1217_v8  ;;  %v1205_v18 = vld [vmem:[#allocation2 + $0xe0] sm:$0xf]  ;;  %v1500_v19 = vld [vmem:[#allocation2 + $0xe8] sm:$0xf0] }
  0x9c   :  { %v165_v22 = vmax.f32 %v147_v12, 0.0  ;;  %v166_v23 = vmax.f32 %v160_v13, 0.0  ;;  %v1289_v12 = vld [vmem:[#allocation2 + $0x188] sm:$0xf]  ;;  %v1521_v13 = vld [vmem:[#allocation2 + $0x190] sm:$0xf0] }
  0x9d   :  { %814 = vmatpush.bf16.msrb.mxu0 %v1362_v14  ;;  %v1122_v14 = vor.u32 %v1479_v7, %v1121_v4  ;;  %v1290_v20 = vor.u32 %v1521_v13, %v1289_v12  ;;  %v1563_v58 = vld [vmem:[%s1810_s5 + $0x88] sm:$0xff] }
  0x9e   :  { %v1719_v27 = vpack.c.bf16 %v165_v22, %v165_v22  ;;  %v1721_v28 = vpack.c.bf16 %v166_v23, %v166_v23  ;;  %v1206_v22 = vor.u32 %v1500_v19, %v1205_v18  ;;  %v1097_v23 = vld [vmem:[#allocation2 + $0x8] sm:$0xf] }
  0xa0   :  { %717 = vmatmul.bf16.vlgmr.msrb.gmra.mxu2 %v1719_v27  ;;  %1387 = vmatmul.msk.bf16.vlgmr.msrb.gmra.mxu3 %vm679_vm2, %v1721_v28 }
  0xa1   :  { %v148_v35 = vpop.f32.mrf.mxu2  ;;  %v161_v36 = vpop.f32.mrf.mxu3  ;;  %787 = vmatpush.bf16.msrb.mxu2 %v1182_v24  ;;  %800 = vmatpush.bf16.msrb.mxu3 %v1278_v25  ;;  %v1473_v24 = vld [vmem:[#allocation2 + $0x10] sm:$0xf0]  ;;  %v1193_v25 = vld [vmem:[#allocation2 + $0xc8] sm:$0xf] }
  0xa2   :  { %815 = vmatpush.bf16.msrb.mxu0 %v1350_v29  ;;  %v1098_v29 = vor.u32 %v1473_v24, %v1097_v23  ;;  %v1194_v30 = vor.u32 %v1497_v26, %v1193_v25  ;;  %v1558_v35 = vld [vmem:[%s1810_s5 + $0x60] sm:$0xff]  ;;  %v1557_v36 = vld [vmem:[%s1810_s5 + $0x58] sm:$0xff] }
  0xa5   :  { %788 = vmatpush.bf16.msrb.mxu2 %v1170_v37  ;;  %801 = vmatpush.bf16.msrb.mxu3 %v1266_v38  ;;  %v1556_v37 = vld [vmem:[%s1810_s5 + $0x50] sm:$0xff]  ;;  %v271_v38 = vld [vmem:[%s1809_s4] sm:$0x7] }
  0xa6   :  { %816 = vmatpush.bf16.msrb.mxu0 %v1338_v40  ;;  %v273_v42 = vperm.slane %v271_v38, 0  ;;  %v275_v19 = vperm.slane %v271_v38, 2 }
  0xa8   :  { %756 = vmatmul.bf16.vlgmr.msra.gmra.mxu0 %v1715_v6  ;;  %769 = vmatmul.bf16.vlgmr.msra.gmra.mxu1 %v1719_v27 }
  0xa9   :  { %789 = vmatpush.bf16.msrb.mxu2 %v1158_v46  ;;  %802 = vmatpush.bf16.msrb.mxu3 %v1254_v47 }
  0xaa   :  { %817 = vmatpush.bf16.msrb.mxu0 %v1326_v52  ;;  %1008 = vmatpush.bf16.msra.mxu1 %v1553_v53  ;;  %v1006_v53 = vsel %vm1004_vm3, %v1465_v50, 0 }
  0xad   :  { %790 = vmatpush.bf16.msrb.mxu2 %v1146_v56  ;;  %803 = vmatpush.bf16.msrb.mxu3 %v1242_v57 }
  0xae   :  { %818 = vmatpush.bf16.msrb.mxu0 %v1314_v62  ;;  %1009 = vmatpush.bf16.msra.mxu1 %v1552_v63  ;;  %v1562_v63 = vld [vmem:[%s1810_s5 + $0x80] sm:$0xff] }
  0xb0   :  { %743 = vmatmul.bf16.vlgmr.msra.gmra.mxu3 %v1713_v5  ;;  %1388 = vmatmul.msk.bf16.vlgmr.msra.gmra.mxu2 %vm679_vm2, %v1721_v28 }
  0xb1   :  { %791 = vmatpush.bf16.msrb.mxu2 %v1134_v2  ;;  %804 = vmatpush.bf16.msrb.mxu3 %v1230_v3  ;;  %v274_v2 = vperm.slane %v271_v38, 1 }
  0xb2   :  { %819 = vmatpush.bf16.msrb.mxu0 %v1302_v10  ;;  %1010 = vmatpush.bf16.msra.mxu1 %v1551_v11 }
  0xb5   :  { %792 = vmatpush.bf16.msrb.mxu2 %v1122_v14  ;;  %805 = vmatpush.bf16.msrb.mxu3 %v1218_v15 }
  0xb6   :  { %820 = vmatpush.bf16.msrb.mxu0 %v1290_v20  ;;  %1011 = vmatpush.bf16.msra.mxu1 %v1550_v31 }
  0xb8   :  { %1389 = vmatmul.msk.bf16.vlgmr.msrb.gmra.mxu1 %vm679_vm2, %v1721_v28  ;;  %v1560_v28 = vld [vmem:[%s1810_s5 + $0x70] sm:$0xff] }
  0xb9   :  { %793 = vmatpush.bf16.msrb.mxu2 %v1110_v21  ;;  %806 = vmatpush.bf16.msrb.mxu3 %v1206_v22 }
  0xba   :  { %821 = vmatmul.bf16.vlgmr.msrb.gmra.mxu0 %v1719_v27  ;;  %1012 = vmatpush.bf16.msra.mxu1 %v1549_v32  ;;  %v1548_v27 = vld [vmem:[%s1810_s5 + $0x10] sm:$0xff] }
  0xbd   :  { %794 = vmatpush.bf16.msrb.mxu2 %v1098_v29  ;;  %807 = vmatpush.bf16.msrb.mxu3 %v1194_v30 }
  0xbe   :  { %1013 = vmatpush.bf16.msra.mxu1 %v1548_v27 }
  0xc0   :  { %795 = vmatmul.bf16.vlgmr.msrb.gmra.mxu2 %v1713_v5  ;;  %808 = vmatmul.bf16.vlgmr.msrb.gmra.mxu3 %v1715_v6  ;;  %v1561_v5 = vld [vmem:[%s1810_s5 + $0x78] sm:$0xff]  ;;  %v1547_v6 = vld [vmem:[%s1810_s5 + $0x8] sm:$0xff] }
  0xc1   :  { %1021 = vmatpush.bf16.msra.mxu2 %v1561_v5  ;;  %1039 = vmatpush.bf16.msra.mxu3 %v1006_v53 }
  0xc2   :  { %1014 = vmatpush.bf16.msra.mxu1 %v1547_v6 }
  0xc5   :  { %1022 = vmatpush.bf16.msra.mxu2 %v1560_v28  ;;  %1040 = vmatpush.bf16.msra.mxu3 %v1563_v58  ;;  %v1570_v28 = vld [vmem:[%s1811_s6] ss:$0 sm:$0xff] }
  0xc6   :  { %1015 = vmatpush.bf16.msra.mxu1 %v1546_v33 }
  0xc9   :  { %1023 = vmatpush.bf16.msra.mxu2 %v1559_v34  ;;  %1041 = vmatpush.bf16.msra.mxu3 %v1562_v63 }
  0xcd   :  { %1024 = vmatpush.bf16.msra.mxu2 %v1558_v35 }
  0xd1   :  { %1025 = vmatpush.bf16.msra.mxu2 %v1557_v36 }
  0xd5   :  { %1026 = vmatpush.bf16.msra.mxu2 %v1556_v37 }
  0xd9   :  { %1027 = vmatpush.bf16.msra.mxu2 %v1555_v41 }
  0xdd   :  { %1028 = vmatpush.bf16.msra.mxu2 %v1554_v43 }
 0x115   :  { %v692_v39 = vpop.f32.mrf.mxu0  ;;  %v705_v40 = vpop.f32.mrf.mxu1 }
 0x116   :  { %v693_v44 = vadd.f32 %v692_v39, %v273_v42 }
 0x118   :  { %v706_v47 = vadd.f32 %v705_v40, %v693_v44 }
 0x11d   :  { %v694_v45 = vpop.f32.mrf.mxu0  ;;  %v707_v46 = vpop.f32.mrf.mxu1 }
 0x123   :  { %v718_v51 = vpop.f32.mrf.mxu2  ;;  %v731_v52 = vpop.f32.mrf.mxu3 }
 0x124   :  { %v719_v54 = vadd.f32 %v718_v51, %v706_v47 }
 0x125   :  { %v757_v56 = vpop.f32.mrf.mxu0  ;;  %v770_v57 = vpop.f32.mrf.mxu1 }
 0x126   :  { %v732_v55 = vadd.f32 %v731_v52, %v719_v54 }
 0x128   :  { %v839_v59 = vmax.f32 %v732_v55, 0.0 }
 0x12a   :  { %v842_v60 = vpack.c.bf16 %v839_v59, %v839_v59 }
 0x12b   :  { %v720_v61 = vpop.f32.mrf.mxu2  ;;  %v733_v62 = vpop.f32.mrf.mxu3 }
 0x12c   :  { %1016 = vmatmul.bf16.vlgmr.msra.gmra.mxu1 %v842_v60 }
 0x12d   :  { %v759_v0 = vpop.f32.mrf.mxu0  ;;  %v772_v1 = vpop.f32.mrf.mxu1 }
 0x133   :  { %v744_v3 = vpop.f32.mrf.mxu3  ;;  %v783_v4 = vpop.f32.mrf.mxu2 }
 0x134   :  { %v745_v7 = vadd.f32 %v744_v3, %v274_v2 }
 0x135   :  { %v835_v10 = vpop.f32.mrf.mxu1 }
 0x136   :  { %v758_v8 = vadd.f32 %v757_v56, %v745_v7 }
 0x137   :  { %v822_v9 = vpop.f32.mrf.mxu0 }
 0x138   :  { %v771_v11 = vadd.f32 %v770_v57, %v758_v8 }
 0x13a   :  { %v784_v12 = vadd.f32 %v783_v4, %v771_v11 }
 0x13b   :  { %v746_v13 = vpop.f32.mrf.mxu3  ;;  %v785_v14 = vpop.f32.mrf.mxu2 }
 0x13c   :  { %v840_v15 = vmax.f32 %v784_v12, 0.0 }
 0x13d   :  { %v837_v18 = vpop.f32.mrf.mxu1 }
 0x13e   :  { %v843_v16 = vpack.c.bf16 %v840_v15, %v840_v15 }
 0x13f   :  { %v824_v17 = vpop.f32.mrf.mxu0 }
 0x140   :  { %1029 = vmatmul.bf16.vlgmr.msra.gmra.mxu2 %v843_v16 }
 0x143   :  { %v796_v20 = vpop.f32.mrf.mxu2  ;;  %v809_v21 = vpop.f32.mrf.mxu3 }
 0x144   :  { %v797_v22 = vadd.f32 %v796_v20, %v275_v19 }
 0x146   :  { %v810_v23 = vadd.f32 %v809_v21, %v797_v22 }
 0x148   :  { %v823_v24 = vadd.f32 %v822_v9, %v810_v23 }
 0x14a   :  { %v836_v25 = vadd.f32 %v835_v10, %v823_v24 }
 0x14b   :  { %v798_v26 = vpop.f32.mrf.mxu2  ;;  %v811_v29 = vpop.f32.mrf.mxu3 }
 0x14c   :  { %v841_v30 = vmax.f32 %v836_v25, 0.0 }
 0x14e   :  { %v844_v31 = vpack.c.bf16 %v841_v30, %v841_v30 }
 0x150   :  { %1466 = vmatmul.msk.bf16.vlgmr.msra.gmra.mxu3 %vm1000_vm4, %v844_v31 }
 0x1a9   :  { %v1017_v32 = vpop.f32.mrf.mxu1 }
 0x1aa   :  { %v1018_v33 = vadd.f32 %v1570_v28, %v1017_v32 }
 0x1b1   :  { %v1019_v27 = vpop.f32.mrf.mxu1 }
 0x1c3   :  { %v1030_v5 = vpop.f32.mrf.mxu2 }
 0x1c4   :  { %v1031_v34 = vadd.f32 %v1030_v5, %v1018_v33 }
 0x1cb   :  { %v1032_v6 = vpop.f32.mrf.mxu2 }
 0x1d3   :  { %v1043_v35 = vpop.f32.mrf.mxu3 }
 0x1d4   :  { %v1044_v36 = vadd.f32 %v1043_v35, %v1031_v34 }
 0x1d6   :  { %1571 = vtanh.f32 %v1044_v36 }
 0x1db   :  { %v1045_v37 = vpop.f32.mrf.mxu3 }
 0x1dc   :  { %v1572_v38 = vpop.eup %1571 }
 0x1dd   :  { %1049 = vst.msk [vmem:[#allocation5] sm:$0x3] %vm1048_vm5, %v1572_v38 }
 0x1de   :  { %1060 = dma.vmem_to_hbm [thread:$0]  %s1056_s20, 32, %s1058_s23, [#allocation4]  }
 0x1df   :  { %1623 = dma.done.wait [#allocation4], 32  }
 0x1e0   :  { %1624 = vsyncadd [#allocation4], 4294967264 }
 0x1e1   :  { %1065 = vsyncpa [#allocation3], 1 }
 0x1e2   :  { %1066 = vsyncpa [#allocation4], 1 }

</bundles_post_ra>
